<compile_context>
chip_gen: v7x
topology: tpu7x:2x2x1
jax: 0.10.0
libtpu: 0.0.40
codegen_flags: <defaults>
</compile_context>

<pallas_src>
import math

import jax
import jax.numpy as jnp
from jax.experimental import pallas as pl
from jax.experimental.pallas import tpu as pltpu


# ---------------- Pallas kernel ----------------

def _fused_deconv_add_kernel(x_ref, we_ref, wo_ref, b_ref, x2_ref, o_ref,
                             acc_e_ref, acc_o_ref):
    # x_ref  : (tm, tk)            bf16 tile of flattened x1 rows (tm = rw*W)
    # we/wo  : (tk, 2*Cout)        bf16 weights for even / odd output rows
    # b_ref  : (1, 2*Cout)         f32 bias, tiled over kj
    # x2_ref : (rw, 2, W, 2*Cout)  skip tile, already in the output layout
    # o_ref  : (rw, 2, W, 2*Cout)  output tile (x2.dtype)
    # acc_*  : (tm, 2*Cout)        f32 VMEM accumulators (persist across K steps)
    k = pl.program_id(1)
    nk = pl.num_programs(1)

    @pl.when(k == 0)
    def _init():
        acc_e_ref[...] = jnp.zeros_like(acc_e_ref)
        acc_o_ref[...] = jnp.zeros_like(acc_o_ref)

    x = x_ref[...]
    acc_e_ref[...] += jnp.dot(x, we_ref[...], preferred_element_type=jnp.float32)
    acc_o_ref[...] += jnp.dot(x, wo_ref[...], preferred_element_type=jnp.float32)

    @pl.when(k == nk - 1)
    def _finalize():
        rw, _, w_sz, c2 = o_ref.shape
        b = b_ref[...].astype(jnp.float32)                      # (1, 2*Cout)
        even = (acc_e_ref[...] + b).reshape(rw, w_sz, c2)
        odd = (acc_o_ref[...] + b).reshape(rw, w_sz, c2)
        even = even + x2_ref[:, 0, :, :].astype(jnp.float32)
        odd = odd + x2_ref[:, 1, :, :].astype(jnp.float32)
        o_ref[:, 0, :, :] = even.astype(o_ref.dtype)
        o_ref[:, 1, :, :] = odd.astype(o_ref.dtype)


# ---------------- tiling / budget ----------------

def _tpu_vmem_bytes():
    try:
        return int(pltpu.get_tpu_info().vmem_capacity_bytes)
    except Exception:
        return 64 * 1024 * 1024          # conservative fallback (v7x per-core)


def _choose_tiles(NH, W, Cin, c2, x_item, x2_item, o_item):
    """Pick (rows-per-tile rw, K tile tk, vmem_limit_bytes)."""
    cap = _tpu_vmem_bytes()
    # generation-aware: ~35/48 MiB on v7x (64 MiB VMEM), ~70/96 MiB on v5e/v6e.
    budget = min(int(cap * 0.55), 96 * 1024 * 1024)
    limit = min(int(cap * 0.75), 112 * 1024 * 1024)
    w_item = x_item                       # weights use the compute dtype

    # K tile: both weight halves resident, *double-buffered* by the pipeline.
    def w_bytes(tk):
        return 2 * (2 * tk * c2 * w_item)

    tk = Cin
    if w_bytes(Cin) > budget // 3:
        for cand in (512, 256, 128):      # x-block lane dim must be 128-aligned
            if Cin % cand == 0 and w_bytes(cand) <= budget // 3:
                tk = cand
                break

    resident = w_bytes(tk) + 2 * c2 * 4   # + double-buffered bias row
    avail = max(budget - resident, 0)

    # Streamed bytes per input image row (double-buffered x, x2, out) + f32 accs.
    per_row = (2 * (W * tk * x_item + 2 * W * c2 * (x2_item + o_item))
               + 2 * W * c2 * 4)
    max_rows = max(1, avail // per_row)

    if NH <= 1:
        return NH, tk, limit

    # granularity so tm = rw*W is a multiple of 8 (layout), prefer 16 (bf16
    # sublane packing) and 256 (MXU-aligned) when affordable.
    g = max(1, 8 // math.gcd(W, 8))
    for align in (256, 16):
        ga = max(1, align // math.gcd(W, align))
        if ga <= max_rows and ga <= max(1, NH // 2):
            g = ga
            break
    if NH <= g:
        return NH, tk, limit              # single full block (tm == M is legal)

    rw = min(max_rows, max(1, 1024 // W), NH)   # cap tm ~1024 rows
    rw = max(g, (rw // g) * g)
    # Keep >= 2 grid blocks so the v7x megacore (2 TensorCores) both get work;
    # one extra 0.35us grid step is noise on 1-TC v5e/v6e.
    half = -(-NH // 2)
    half = -(-half // g) * g
    rw = max(g, min(rw, half))
    return rw, tk, limit


# ---------------- wrapper around pallas_call ----------------

def fused_deconv_add(x_flat, w_e, w_o, b2, x2_blk):
    M, Cin = x_flat.shape
    NH, _, W, c2 = x2_blk.shape
    o_dtype = x2_blk.dtype
    rw, tk, vmem_limit = _choose_tiles(
        NH, W, Cin, c2,
        jnp.dtype(x_flat.dtype).itemsize,
        jnp.dtype(x2_blk.dtype).itemsize,
        jnp.dtype(o_dtype).itemsize)
    tm = rw * W
    nm = pl.cdiv(NH, rw)
    nk = pl.cdiv(Cin, tk)

    cost = pl.CostEstimate(
        flops=4 * M * Cin * c2,
        transcendentals=0,
        bytes_accessed=int(M * Cin * jnp.dtype(x_flat.dtype).itemsize
                           + 2 * Cin * c2 * jnp.dtype(w_e.dtype).itemsize
                             * (nm if nk > 1 else 1)
                           + 2 * M * c2 * (jnp.dtype(x2_blk.dtype).itemsize
                                           + jnp.dtype(o_dtype).itemsize)),
    )

    return pl.pallas_call(
        _fused_deconv_add_kernel,
        out_shape=jax.ShapeDtypeStruct((NH, 2, W, c2), o_dtype),
        grid_spec=pltpu.PrefetchScalarGridSpec(
            num_scalar_prefetch=0,
            grid=(nm, nk),
            in_specs=[
                pl.BlockSpec((tm, tk), lambda i, k: (i, k)),          # x tile
                pl.BlockSpec((tk, c2), lambda i, k: (k, 0)),          # w_even
                pl.BlockSpec((tk, c2), lambda i, k: (k, 0)),          # w_odd
                pl.BlockSpec((1, c2), lambda i, k: (0, 0)),           # bias
                pl.BlockSpec((rw, 2, W, c2), lambda i, k: (i, 0, 0, 0)),  # x2
            ],
            out_specs=pl.BlockSpec((rw, 2, W, c2), lambda i, k: (i, 0, 0, 0)),
            scratch_shapes=[pltpu.VMEM((tm, c2), jnp.float32),
                            pltpu.VMEM((tm, c2), jnp.float32)],
        ),
        compiler_params=pltpu.CompilerParams(
            dimension_semantics=("parallel", "arbitrary"),
            vmem_limit_bytes=vmem_limit,
        ),
        cost_estimate=cost,
    )(x_flat, w_e, w_o, b2, x2_blk)


def up_forward(x1, x2, weight, bias, compute_dtype=jnp.bfloat16):
    """Equivalent of the PyTorch `up` module.

    x1:     (N, Cin, H, W)        NCHW
    x2:     (N, Cin//2, H2, W2)   NCHW  (H2 >= 2H, W2 >= 2W)
    weight: (Cin, Cout, 2, 2)     PyTorch ConvTranspose2d layout
    bias:   (Cout,)
    """
    N, Cin, H, W = x1.shape
    Cout = weight.shape[1]
    H2, W2 = x2.shape[2], x2.shape[3]
    diffY, diffX = H2 - 2 * H, W2 - 2 * W
    # TODO(synk): negative padding (x2 smaller than the upsampled x1) would need
    # the crop path of F.pad; assert instead of silently producing wrong shapes.
    assert diffY >= 0 and diffX >= 0, "x2 must be at least as large as 2H x 2W"
    py, px = diffY // 2, diffX // 2
    c2 = 2 * Cout

    # ---- matmul operands (bf16 on the MXU, f32 accumulation in-kernel) ----
    x_flat = (jnp.transpose(x1, (0, 2, 3, 1))
              .reshape(N * H * W, Cin).astype(compute_dtype))
    w_e = (jnp.transpose(weight[:, :, 0, :], (0, 2, 1))
           .reshape(Cin, c2).astype(compute_dtype))              # ki = 0 rows
    w_o = (jnp.transpose(weight[:, :, 1, :], (0, 2, 1))
           .reshape(Cin, c2).astype(compute_dtype))              # ki = 1 rows
    b2 = jnp.concatenate([bias, bias]).reshape(1, c2).astype(jnp.float32)

    # ---- x2 interior in the kernel's output layout (reshape only, no rearrange) ----
    x2_nhwc = jnp.transpose(x2, (0, 2, 3, 1))                    # (N, H2, W2, Cout)
    x2_in = x2_nhwc if (diffY == 0 and diffX == 0) else \
        x2_nhwc[:, py:py + 2 * H, px:px + 2 * W, :]
    x2_blk = x2_in.reshape(N * H, 2, W, c2)                      # free reshape

    # ---- fused deconv + bias + skip-add + (ki,kj) interleave (Pallas) ----
    out_blk = fused_deconv_add(x_flat, w_e, w_o, b2, x2_blk)     # (N*H, 2, W, 2*Cout)
    out_nhwc = out_blk.reshape(N, 2 * H, 2 * W, Cout)            # free reshape

    if diffY == 0 and diffX == 0:
        return jnp.transpose(out_nhwc, (0, 3, 1, 2))             # NHWC -> NCHW

    # Padded path: the zero-padded deconv border equals x2, so drop the computed
    # interior into the NHWC *intermediate* (updated in place under jit — no
    # extra round trip on the original x2 input), then one transpose to NCHW.
    full = x2_nhwc.at[:, py:py + 2 * H, px:px + 2 * W, :].set(out_nhwc)
    return jnp.transpose(full, (0, 3, 1, 2))


# ---------------- reference (pure JAX, f32) for sanity check ----------------

def up_reference(x1, x2, weight, bias):
    N, Cin, H, W = x1.shape
    Cout = weight.shape[1]
    t = jnp.einsum('nchw,cdij->ndhwij', x1, weight)              # (N, Cout, H, W, 2, 2)
    t = t + bias[None, :, None, None, None, None]
    t = jnp.transpose(t, (0, 1, 2, 4, 3, 5)).reshape(N, Cout, 2 * H, 2 * W)
    H2, W2 = x2.shape[2], x2.shape[3]
    diffY, diffX = H2 - 2 * H, W2 - 2 * W
    t = jnp.pad(t, ((0, 0), (0, 0),
                    (diffY // 2, diffY - diffY // 2),
                    (diffX // 2, diffX - diffX // 2)))
    return x2 + t


if __name__ == "__main__":
    key = jax.random.PRNGKey(0)
    k1, k2, k3, k4, k5 = jax.random.split(key, 5)

    N, in_ch, H, W = 2, 4, 8, 8
    out_ch = in_ch // 2

    x1 = jax.random.normal(k1, (N, in_ch, H, W), dtype=jnp.float32)
    weight = 0.1 * jax.random.normal(k3, (in_ch, out_ch, 2, 2), dtype=jnp.float32)
    bias = 0.1 * jax.random.normal(k4, (out_ch,), dtype=jnp.float32)

    up_fn = jax.jit(up_forward)

    # case 1: x2 exactly matches the upsampled size (no padding)
    x2a = jax.random.normal(k2, (N, out_ch, 2 * H, 2 * W), dtype=jnp.float32)
    ya = jax.block_until_ready(up_fn(x1, x2a, weight, bias))
    ya_ref = up_reference(x1, x2a, weight, bias)
    assert ya.shape == x2a.shape
    assert jnp.allclose(ya, ya_ref, atol=3e-2, rtol=3e-2), \
        float(jnp.max(jnp.abs(ya - ya_ref)))

    # case 2: x2 larger -> padding path (border stays equal to x2)
    x2b = jax.random.normal(k5, (N, out_ch, 2 * H + 3, 2 * W + 2), dtype=jnp.float32)
    yb = jax.block_until_ready(up_fn(x1, x2b, weight, bias))
    yb_ref = up_reference(x1, x2b, weight, bias)
    assert yb.shape == x2b.shape
    assert jnp.allclose(yb, yb_ref, atol=3e-2, rtol=3e-2), \
        float(jnp.max(jnp.abs(yb - yb_ref)))

    print("KERNEL_OK")
</pallas_src>

<mosaic_0001>
module attributes {stable_mosaic.version = 11 : i64} {
  func.func @_fused_deconv_add_kernel(%arg0: i32, %arg1: i32, %arg2: memref<64x4xbf16, #tpu.memory_space<vmem>>, %arg3: memref<4x4xbf16, #tpu.memory_space<vmem>>, %arg4: memref<4x4xbf16, #tpu.memory_space<vmem>>, %arg5: memref<1x4xf32, #tpu.memory_space<vmem>>, %arg6: memref<8x2x8x4xf32, #tpu.memory_space<vmem>>, %arg7: memref<8x2x8x4xf32, #tpu.memory_space<vmem>>, %arg8: memref<64x4xf32, #tpu.memory_space<vmem>>, %arg9: memref<64x4xf32, #tpu.memory_space<vmem>>) attributes {dimension_semantics = [#tpu.dimension_semantics<parallel>, #tpu.dimension_semantics<arbitrary>], iteration_bounds = array<i64: 2, 1>, scalar_prefetch = 0 : i64, scratch_operands = 2 : i64, tpu.core_type = #tpu.core_type<tc>, window_params = [{transform_indices = @transform_0, window_bounds = array<i64: 64, 4>}, {transform_indices = @transform_1, window_bounds = array<i64: 4, 4>}, {transform_indices = @transform_2, window_bounds = array<i64: 4, 4>}, {pipeline_mode = #tpu.pipeline_mode<synchronous>, transform_indices = @transform_3, window_bounds = array<i64: 1, 4>}, {transform_indices = @transform_4, window_bounds = array<i64: 8, 2, 8, 4>}, {transform_indices = @transform_5, window_bounds = array<i64: 8, 2, 8, 4>}]} {
    %c0_i32 = arith.constant 0 : i32
    %0 = arith.cmpi eq, %arg1, %c0_i32 : i32
    %1 = arith.extui %0 : i1 to i32
    %c0_i32_0 = arith.constant 0 : i32
    %2 = arith.cmpi ne, %1, %c0_i32_0 : i32
    scf.if %2 {
      %cst_17 = arith.constant 0.000000e+00 : f32
      %17 = vector.broadcast %cst_17 : f32 to vector<64x4xf32>
      %c0_18 = arith.constant 0 : index
      %c0_19 = arith.constant 0 : index
      %18 = vector.load %arg8[%c0_18, %c0_19] : memref<64x4xf32, #tpu.memory_space<vmem>>, vector<64x4xf32>
      tpu.vector_store %arg8[%c0_18, %c0_19], %17 {strides = array<i32>} : memref<64x4xf32, #tpu.memory_space<vmem>>, vector<64x4xf32>,
      %cst_20 = arith.constant 0.000000e+00 : f32
      %19 = vector.broadcast %cst_20 : f32 to vector<64x4xf32>
      %c0_21 = arith.constant 0 : index
      %c0_22 = arith.constant 0 : index
      %20 = vector.load %arg9[%c0_21, %c0_22] : memref<64x4xf32, #tpu.memory_space<vmem>>, vector<64x4xf32>
      tpu.vector_store %arg9[%c0_21, %c0_22], %19 {strides = array<i32>} : memref<64x4xf32, #tpu.memory_space<vmem>>, vector<64x4xf32>,
    } else {
    }
    %c0 = arith.constant 0 : index
    %c0_1 = arith.constant 0 : index
    %3 = vector.load %arg2[%c0, %c0_1] : memref<64x4xbf16, #tpu.memory_space<vmem>>, vector<64x4xbf16>
    %c0_2 = arith.constant 0 : index
    %c0_3 = arith.constant 0 : index
    %4 = vector.load %arg8[%c0_2, %c0_3] : memref<64x4xf32, #tpu.memory_space<vmem>>, vector<64x4xf32>
    %c0_4 = arith.constant 0 : index
    %c0_5 = arith.constant 0 : index
    %5 = vector.load %arg3[%c0_4, %c0_5] : memref<4x4xbf16, #tpu.memory_space<vmem>>, vector<4x4xbf16>
    %cst = arith.constant dense<0.000000e+00> : vector<64x4xf32>
    %6 = tpu.matmul %3, %5, %cst {dimension_numbers = #tpu.dot_dimension_numbers<[1], [0], [0], [1], [0, 0, 1, 1], [], []>} : vector<64x4xbf16>, vector<4x4xbf16>, vector<64x4xf32> -> vector<64x4xf32>
    %7 = arith.addf %4, %6 : vector<64x4xf32>
    %c0_6 = arith.constant 0 : index
    %c0_7 = arith.constant 0 : index
    %8 = vector.load %arg8[%c0_6, %c0_7] : memref<64x4xf32, #tpu.memory_space<vmem>>, vector<64x4xf32>
    tpu.vector_store %arg8[%c0_6, %c0_7], %7 {strides = array<i32>} : memref<64x4xf32, #tpu.memory_space<vmem>>, vector<64x4xf32>,
    %c0_8 = arith.constant 0 : index
    %c0_9 = arith.constant 0 : index
    %9 = vector.load %arg9[%c0_8, %c0_9] : memref<64x4xf32, #tpu.memory_space<vmem>>, vector<64x4xf32>
    %c0_10 = arith.constant 0 : index
    %c0_11 = arith.constant 0 : index
    %10 = vector.load %arg4[%c0_10, %c0_11] : memref<4x4xbf16, #tpu.memory_space<vmem>>, vector<4x4xbf16>
    %cst_12 = arith.constant dense<0.000000e+00> : vector<64x4xf32>
    %11 = tpu.matmul %3, %10, %cst_12 {dimension_numbers = #tpu.dot_dimension_numbers<[1], [0], [0], [1], [0, 0, 1, 1], [], []>} : vector<64x4xbf16>, vector<4x4xbf16>, vector<64x4xf32> -> vector<64x4xf32>
    %12 = arith.addf %9, %11 : vector<64x4xf32>
    %c0_13 = arith.constant 0 : index
    %c0_14 = arith.constant 0 : index
    %13 = vector.load %arg9[%c0_13, %c0_14] : memref<64x4xf32, #tpu.memory_space<vmem>>, vector<64x4xf32>
    tpu.vector_store %arg9[%c0_13, %c0_14], %12 {strides = array<i32>} : memref<64x4xf32, #tpu.memory_space<vmem>>, vector<64x4xf32>,
    %c0_i32_15 = arith.constant 0 : i32
    %14 = arith.cmpi eq, %arg1, %c0_i32_15 : i32
    %15 = arith.extui %14 : i1 to i32
    %c0_i32_16 = arith.constant 0 : i32
    %16 = arith.cmpi ne, %15, %c0_i32_16 : i32
    scf.if %16 {
      %c0_17 = arith.constant 0 : index
      %c0_18 = arith.constant 0 : index
      %17 = vector.load %arg5[%c0_17, %c0_18] : memref<1x4xf32, #tpu.memory_space<vmem>>, vector<1x4xf32>
      %c0_19 = arith.constant 0 : index
      %c0_20 = arith.constant 0 : index
      %18 = vector.load %arg8[%c0_19, %c0_20] : memref<64x4xf32, #tpu.memory_space<vmem>>, vector<64x4xf32>
      %19 = vector.broadcast %17 : vector<1x4xf32> to vector<64x4xf32>
      %20 = arith.addf %18, %19 : vector<64x4xf32>
      %21 = vector.shape_cast %20 : vector<64x4xf32> to vector<8x8x4xf32>
      %c0_21 = arith.constant 0 : index
      %c0_22 = arith.constant 0 : index
      %22 = vector.load %arg9[%c0_21, %c0_22] : memref<64x4xf32, #tpu.memory_space<vmem>>, vector<64x4xf32>
      %23 = vector.broadcast %17 : vector<1x4xf32> to vector<64x4xf32>
      %24 = arith.addf %22, %23 : vector<64x4xf32>
      %25 = vector.shape_cast %24 : vector<64x4xf32> to vector<8x8x4xf32>
      %c0_23 = arith.constant 0 : index
      %c0_24 = arith.constant 0 : index
      %c0_25 = arith.constant 0 : index
      %c0_26 = arith.constant 0 : index
      %26 = vector.load %arg6[%c0_23, %c0_24, %c0_25, %c0_26] : memref<8x2x8x4xf32, #tpu.memory_space<vmem>>, vector<8x1x8x4xf32>
      %27 = vector.shape_cast %26 : vector<8x1x8x4xf32> to vector<8x8x4xf32>
      %28 = arith.addf %21, %27 : vector<8x8x4xf32>
      %c0_27 = arith.constant 0 : index
      %c1 = arith.constant 1 : index
      %c0_28 = arith.constant 0 : index
      %c0_29 = arith.constant 0 : index
      %29 = vector.load %arg6[%c0_27, %c1, %c0_28, %c0_29] : memref<8x2x8x4xf32, #tpu.memory_space<vmem>>, vector<8x1x8x4xf32>
      %30 = vector.shape_cast %29 : vector<8x1x8x4xf32> to vector<8x8x4xf32>
      %31 = arith.addf %25, %30 : vector<8x8x4xf32>
      %c0_30 = arith.constant 0 : index
      %c0_31 = arith.constant 0 : index
      %c0_32 = arith.constant 0 : index
      %c0_33 = arith.constant 0 : index
      %32 = vector.load %arg7[%c0_30, %c0_31, %c0_32, %c0_33] : memref<8x2x8x4xf32, #tpu.memory_space<vmem>>, vector<8x1x8x4xf32>
      %33 = vector.shape_cast %32 : vector<8x1x8x4xf32> to vector<8x8x4xf32>
      %34 = vector.shape_cast %28 : vector<8x8x4xf32> to vector<8x1x8x4xf32>
      tpu.vector_store %arg7[%c0_30, %c0_31, %c0_32, %c0_33], %34 {strides = array<i32>} : memref<8x2x8x4xf32, #tpu.memory_space<vmem>>, vector<8x1x8x4xf32>,
      %c0_34 = arith.constant 0 : index
      %c1_35 = arith.constant 1 : index
      %c0_36 = arith.constant 0 : index
      %c0_37 = arith.constant 0 : index
      %35 = vector.load %arg7[%c0_34, %c1_35, %c0_36, %c0_37] : memref<8x2x8x4xf32, #tpu.memory_space<vmem>>, vector<8x1x8x4xf32>
      %36 = vector.shape_cast %35 : vector<8x1x8x4xf32> to vector<8x8x4xf32>
      %37 = vector.shape_cast %31 : vector<8x8x4xf32> to vector<8x1x8x4xf32>
      tpu.vector_store %arg7[%c0_34, %c1_35, %c0_36, %c0_37], %37 {strides = array<i32>} : memref<8x2x8x4xf32, #tpu.memory_space<vmem>>, vector<8x1x8x4xf32>,
    } else {
    }
    return
  }
  func.func @transform_0(%arg0: i32, %arg1: i32) -> (i32, i32) {
    %c0_i32 = arith.constant 0 : i32
    return %arg0, %arg1 : i32, i32
  }
  func.func @transform_1(%arg0: i32, %arg1: i32) -> (i32, i32) {
    %c0_i32 = arith.constant 0 : i32
    %c0_i32_0 = arith.constant 0 : i32
    return %arg1, %c0_i32 : i32, i32
  }
  func.func @transform_2(%arg0: i32, %arg1: i32) -> (i32, i32) {
    %c0_i32 = arith.constant 0 : i32
    %c0_i32_0 = arith.constant 0 : i32
    return %arg1, %c0_i32 : i32, i32
  }
  func.func @transform_3(%arg0: i32, %arg1: i32) -> (i32, i32) {
    %c0_i32 = arith.constant 0 : i32
    %c0_i32_0 = arith.constant 0 : i32
    %c0_i32_1 = arith.constant 0 : i32
    return %c0_i32, %c0_i32_0 : i32, i32
  }
  func.func @transform_4(%arg0: i32, %arg1: i32) -> (i32, i32, i32, i32) {
    %c0_i32 = arith.constant 0 : i32
    %c0_i32_0 = arith.constant 0 : i32
    %c0_i32_1 = arith.constant 0 : i32
    %c0_i32_2 = arith.constant 0 : i32
    return %arg0, %c0_i32, %c0_i32_0, %c0_i32_1 : i32, i32, i32, i32
  }
  func.func @transform_5(%arg0: i32, %arg1: i32) -> (i32, i32, i32, i32) {
    %c0_i32 = arith.constant 0 : i32
    %c0_i32_0 = arith.constant 0 : i32
    %c0_i32_1 = arith.constant 0 : i32
    %c0_i32_2 = arith.constant 0 : i32
    return %arg0, %c0_i32, %c0_i32_0, %c0_i32_1 : i32, i32, i32, i32
  }
}

</mosaic_0001>

<bundles_post_ra>
// kernel: up_forward.1
= control target key start
LH: loop header
LB: loop body
LE: loop exit
PB: predicated region body
PF: predicated region fallthrough
CT: control target
= control target key end

     0   :  { %s930_s18 = smov 0   ;;  %s932_s19 = smov 0   ;;  %s1102_s0 = inlined_call_operand.vmem [shape: bf16[128,4], index: 0, kind: input, shape index: {}]   ;;  %s1103_s1 = inlined_call_operand.vmem [shape: bf16[4,4], index: 1, kind: input, shape index: {}]   ;;  %s1104_s2 = inlined_call_operand.vmem [shape: bf16[4,4], index: 2, kind: input, shape index: {}]   ;;  %s1105_s3 = inlined_call_operand.vmem [shape: f32[1,4], index: 3, kind: input, shape index: {}]   ;;  %s1106_s4 = inlined_call_operand.vmem [shape: f32[16,2,8,4], index: 4, kind: input, shape index: {}]   ;;  %s1107_s5 = inlined_call_operand.vmem [shape: f32[16,2,8,4], index: 5, kind: output, shape index: {}]  }
   0x1   :  { %s934_s20 = smov 0  }
   0x2 LB: > { %s27_s21 = sadd.s32 1, %s893_s19  ;;  %p772_p0 = scmp.ge.s32.totalorder %s897_s20, 1  ;;  %s897_s20 = sphi %s934_s20, %s15_s20   ;;  %s893_s19 = sphi %s932_s19, %s1110_s19   ;;  %s889_s18 = sphi %s930_s18, %s1109_s18  }
   0x3   : > { %p29_p1 = scmp.ge.s32.totalorder %s27_s21, 2  ;;  %p235_p2 = scmp.lt.s32.totalorder %s897_s20, 3 }
   0x5   : > { %s1112_s21 = smov (%p29_p1, %s27_s21), 0  ;;  %p236_p3 = pnand %p772_p0, %p235_p2 }
   0x6   : > { %v350_v0 = vld [vmem:[%s1103_s1] sm:$0x3] (!%p236_p3)  ;;  %vm384_vm0 = vcmask (!%p236_p3), 1041408   ;;  %s773_s26 = sshll.u32 (!%p236_p3), %s889_s18, 3  ;;  %vm317_vm1 = vcmask (!%p236_p3), 31744   ;;  %v899_v4 = vmov (!%p236_p3), 0.0  }
   0x7   : > { %239 = sbr.rel (%p236_p3) target bundleno = 259 (0x103), region = 40  ;;  %v477_v1 = vld [vmem:[%s1104_s2] sm:$0x3] (!%p236_p3)  ;;  %844 = vmatprep.subr.msk.bf16.mxu0 (!%p236_p3), %vm384_vm0, %v350_v0  ;;  %v386_v2 = vsel (!%p236_p3), %vm384_vm0, %v350_v0, 0  ;;  %p957_p4 = scmp.lt.s32.totalorder (!%p236_p3), %s773_s26, 15  ;;  %320 = vst.msk [vmem:[#allocation2 + $0x10] sm:$0xff] (!%p236_p3), %vm317_vm1, %v899_v4 }
   0x8   : > { %845 = vmatprep.subr.msk.bf16.mxu1 (!%p236_p3), %vm384_vm0, %v477_v1  ;;  %v479_v3 = vsel (!%p236_p3), %vm384_vm0, %v477_v1, 0  ;;  %825 = vmatpush3.bf16.msra.mxu0 (!%p236_p3), %v386_v2  ;;  %318 = vst.msk [vmem:[#allocation2] sm:$0xff] (!%p236_p3), %vm317_vm1, %v899_v4  ;;  %319 = vst.msk [vmem:[#allocation2 + $0x8] sm:$0xff] (!%p236_p3), %vm317_vm1, %v899_v4  ;;  %v1010_v33 = vld [vmem:[%s1105_s3] ss:$0 sm:$0xff] (!%p236_p3) }
   0x9   : > { %835 = vmatpush3.bf16.msra.mxu1 (!%p236_p3), %v479_v3  ;;  %321 = vst.msk [vmem:[#allocation2 + $0x18] sm:$0xff] (!%p236_p3), %vm317_vm1, %v899_v4  ;;  %322 = vst.msk [vmem:[#allocation2 + $0x20] sm:$0xff] (!%p236_p3), %vm317_vm1, %v899_v4 }
   0xa   : > { %323 = vst.msk [vmem:[#allocation2 + $0x28] sm:$0xff] (!%p236_p3), %vm317_vm1, %v899_v4  ;;  %324 = vst.msk [vmem:[#allocation2 + $0x30] sm:$0xff] (!%p236_p3), %vm317_vm1, %v899_v4 }
   0xb   : > { %325 = vst.msk [vmem:[#allocation2 + $0x38] sm:$0xff] (!%p236_p3), %vm317_vm1, %v899_v4  ;;  %326 = vst.msk [vmem:[#allocation3] sm:$0xff] (!%p236_p3), %vm317_vm1, %v899_v4 }
   0xc   : > { %327 = vst.msk [vmem:[#allocation3 + $0x8] sm:$0xff] (!%p236_p3), %vm317_vm1, %v899_v4  ;;  %328 = vst.msk [vmem:[#allocation3 + $0x10] sm:$0xff] (!%p236_p3), %vm317_vm1, %v899_v4 }
   0xd   : > { %329 = vst.msk [vmem:[#allocation3 + $0x18] sm:$0xff] (!%p236_p3), %vm317_vm1, %v899_v4  ;;  %330 = vst.msk [vmem:[#allocation3 + $0x20] sm:$0xff] (!%p236_p3), %vm317_vm1, %v899_v4 }
   0xe   : > { %331 = vst.msk [vmem:[#allocation3 + $0x28] sm:$0xff] %vm317_vm1, %v899_v4  ;;  %332 = vst.msk [vmem:[#allocation3 + $0x30] sm:$0xff] %vm317_vm1, %v899_v4  ;;  %s1114_s26 = smov (!%p957_p4, %s773_s26), 15  ;;  %v344_v9 = vld [vmem:[#allocation2 + $0x10] sm:$0xff] }
   0xf   : > { %333 = vst.msk [vmem:[#allocation3 + $0x38] sm:$0xff] %vm317_vm1, %v899_v4  ;;  %s774_s28 = sshll.u32 %s1114_s26, 2  ;;  %v342_v11 = vld [vmem:[#allocation2] sm:$0xff]  ;;  %v343_v21 = vld [vmem:[#allocation2 + $0x8] sm:$0xff]  ;;  %s812_s7 = sshll.u32 %s1114_s26, 4 }
  0x10   : > { %s288_s6 = scalar_lea.vmem %s1102_s0, %s774_s28  ;;  %v345_v15 = vld [vmem:[#allocation2 + $0x18] sm:$0xff]  ;;  %s1003_s10 = scalar_lea.vmem %s1106_s4, %s812_s7  ;;  %v346_v36 = vld [vmem:[#allocation2 + $0x20] sm:$0xff] }
  0x11   : > { %v871_v5 = vld [vmem:[%s288_s6] sm:$0xff]   ;;  %v872_v6 = vld [vmem:[%s288_s6 + $0x8] sm:$0xff]   ;;  %v873_v7 = vld [vmem:[%s288_s6 + $0x10] sm:$0xff]   ;;  %s1029_s15 = scalar_lea.vmem %s1107_s5, %s812_s7 }
  0x12   : > { %826 = vmatprep.mubr.msk.bf16.mxu0 %vm317_vm1, %v871_v5  ;;  %836 = vmatprep.mubr.msk.bf16.mxu1 %vm317_vm1, %v871_v5  ;;  %v874_v8 = vld [vmem:[%s288_s6 + $0x18] sm:$0xff]   ;;  %v469_v12 = vld [vmem:[#allocation3] sm:$0xff]  ;;  %v348_v34 = vld [vmem:[#allocation2 + $0x30] sm:$0xff] }
  0x13   : > { %827 = vmatmul.mubr.msk.bf16.vlgmr.msra.gmra.mrb[0].mxu0 %vm317_vm1, %v872_v6  ;;  %837 = vmatmul.mubr.msk.bf16.vlgmr.msra.gmra.mrb[0].mxu1 %vm317_vm1, %v872_v6  ;;  %v471_v10 = vld [vmem:[#allocation3 + $0x10] sm:$0xff]  ;;  %v470_v22 = vld [vmem:[#allocation3 + $0x8] sm:$0xff]  ;;  %v349_v38 = vld [vmem:[#allocation2 + $0x38] sm:$0xff] }
  0x14   : > { %830 = vmatprep.mubr.msk.bf16.mxu0 %vm317_vm1, %v873_v7  ;;  %840 = vmatprep.mubr.msk.bf16.mxu1 %vm317_vm1, %v873_v7  ;;  %v472_v16 = vld [vmem:[#allocation3 + $0x18] sm:$0xff]  ;;  %v473_v37 = vld [vmem:[#allocation3 + $0x20] sm:$0xff]  ;;  %v347_v43 = vld [vmem:[#allocation2 + $0x28] sm:$0xff] }
  0x15   : > { %v475_v35 = vld [vmem:[#allocation3 + $0x30] sm:$0xff]  ;;  %v606_v40 = vld [vmem:[%s1003_s10 + $0x20] sm:$0xff]  ;;  %v474_v44 = vld [vmem:[#allocation3 + $0x28] sm:$0xff] }
  0x16   : > { %v476_v39 = vld [vmem:[#allocation3 + $0x38] sm:$0xff]  ;;  %v796_v45 = vld [vmem:[%s1003_s10 + $0x28] sm:$0xff]  ;;  %v604_v46 = vld [vmem:[%s1003_s10] sm:$0xff] }
  0x17   : > { %v794_v47 = vld [vmem:[%s1003_s10 + $0x8] sm:$0xff]  ;;  %v607_v54 = vld [vmem:[%s1003_s10 + $0x30] sm:$0xff]  ;;  %v797_v63 = vld [vmem:[%s1003_s10 + $0x38] sm:$0xff] }
  0x1b   : > { %831 = vmatmul.mubr.msk.bf16.gmra.mrb[4].mxu0 %vm317_vm1, %v874_v8  ;;  %841 = vmatmul.mubr.msk.bf16.gmra.mrb[4].mxu1 %vm317_vm1, %v874_v8  ;;  %v605_v8 = vld [vmem:[%s1003_s10 + $0x10] sm:$0xff] }
  0xe6   : > { %v828_v13 = vpop.f32.mrb[0].mxu0  ;;  %v838_v14 = vpop.f32.mrb[0].mxu1 }
  0xe7   : > { %v455_v17 = vadd.f32 %v828_v13, %v344_v9  ;;  %v548_v18 = vadd.f32 %v838_v14, %v471_v10  ;;  %v422_v19 = vpop.f32.mrb[1].mxu0  ;;  %v515_v20 = vpop.f32.mrb[1].mxu1 }
  0xe8   : > { %v453_v23 = vadd.f32 %v422_v19, %v342_v11  ;;  %v546_v24 = vadd.f32 %v515_v20, %v469_v12  ;;  %v829_v25 = vpop.f32.mrb[2].mxu0  ;;  %v839_v26 = vpop.f32.mrb[2].mxu1 }
  0xe9   : > { %463 = vst.msk [vmem:[#allocation2 + $0x10] sm:$0xff] %vm317_vm1, %v455_v17  ;;  %556 = vst.msk [vmem:[#allocation3 + $0x10] sm:$0xff] %vm317_vm1, %v548_v18  ;;  %v456_v27 = vadd.f32 %v829_v25, %v345_v15  ;;  %v549_v28 = vadd.f32 %v839_v26, %v472_v16  ;;  %v425_v29 = vpop.f32.mrb[3].mxu0  ;;  %v518_v30 = vpop.f32.mrb[3].mxu1  ;;  %v795_v17 = vld [vmem:[%s1003_s10 + $0x18] sm:$0xff]  ;;  %v610_v26 = vld [vmem:[%s1003_s10 + $0x60] sm:$0xff] }
  0xea   : > { %461 = vst.msk [vmem:[#allocation2] sm:$0xff] %vm317_vm1, %v453_v23  ;;  %554 = vst.msk [vmem:[#allocation3] sm:$0xff] %vm317_vm1, %v546_v24  ;;  %v454_v31 = vadd.f32 %v425_v29, %v343_v21  ;;  %v547_v32 = vadd.f32 %v518_v30, %v470_v22  ;;  %v798_v29 = vld [vmem:[%s1003_s10 + $0x48] sm:$0xff] }
  0xeb   : > { %464 = vst.msk [vmem:[#allocation2 + $0x18] sm:$0xff] %vm317_vm1, %v456_v27  ;;  %557 = vst.msk [vmem:[#allocation3 + $0x18] sm:$0xff] %vm317_vm1, %v549_v28  ;;  %v800_v27 = vld [vmem:[%s1003_s10 + $0x68] sm:$0xff]  ;;  %v608_v28 = vld [vmem:[%s1003_s10 + $0x40] sm:$0xff] }
  0xec   : > { %462 = vst.msk [vmem:[#allocation2 + $0x8] sm:$0xff] %vm317_vm1, %v454_v31  ;;  %555 = vst.msk [vmem:[#allocation3 + $0x8] sm:$0xff] %vm317_vm1, %v547_v32  ;;  %v611_v32 = vld [vmem:[%s1003_s10 + $0x70] sm:$0xff] }
  0xee   : > { %v832_v41 = vpop.f32.mrb[4].mxu0  ;;  %v842_v42 = vpop.f32.mrb[4].mxu1 }
  0xef   : > { %v459_v48 = vadd.f32 %v832_v41, %v348_v34  ;;  %v552_v49 = vadd.f32 %v842_v42, %v475_v35  ;;  %v438_v50 = vpop.f32.mrb[5].mxu0  ;;  %v531_v51 = vpop.f32.mrb[5].mxu1 }
  0xf0   : > { %v568_v52 = vld [vmem:[#allocation2 + $0x10] sm:$0xff]  ;;  %v457_v55 = vadd.f32 %v438_v50, %v346_v36  ;;  %v550_v56 = vadd.f32 %v531_v51, %v473_v37  ;;  %v833_v57 = vpop.f32.mrb[6].mxu0  ;;  %v843_v58 = vpop.f32.mrb[6].mxu1  ;;  %v799_v50 = vld [vmem:[%s1003_s10 + $0x58] sm:$0xff] }
  0xf1   : > { %v590_v53 = vld [vmem:[#allocation3 + $0x10] sm:$0xff]  ;;  %v582_v59 = vadd.f32 %v1010_v33, %v568_v52  ;;  %v566_v61 = vld [vmem:[#allocation2] sm:$0xff]  ;;  %467 = vst.msk [vmem:[#allocation2 + $0x30] sm:$0xff] %vm317_vm1, %v459_v48  ;;  %560 = vst.msk [vmem:[#allocation3 + $0x30] sm:$0xff] %vm317_vm1, %v552_v49  ;;  %v460_v0 = vadd.f32 %v833_v57, %v349_v38  ;;  %v553_v1 = vadd.f32 %v843_v58, %v476_v39  ;;  %v441_v2 = vpop.f32.mrb[7].mxu0  ;;  %v534_v3 = vpop.f32.mrb[7].mxu1 }
  0xf2   : > { %v598_v60 = vadd.f32 %v1010_v33, %v590_v53  ;;  %v588_v62 = vld [vmem:[#allocation3] sm:$0xff]  ;;  %v580_v4 = vadd.f32 %v1010_v33, %v566_v61  ;;  %v569_v6 = vld [vmem:[#allocation2 + $0x18] sm:$0xff]  ;;  %465 = vst.msk [vmem:[#allocation2 + $0x20] sm:$0xff] %vm317_vm1, %v457_v55  ;;  %558 = vst.msk [vmem:[#allocation3 + $0x20] sm:$0xff] %vm317_vm1, %v550_v56  ;;  %v458_v9 = vadd.f32 %v441_v2, %v347_v43 }
  0xf3   : > { %v596_v5 = vadd.f32 %v1010_v33, %v588_v62  ;;  %v591_v7 = vld [vmem:[#allocation3 + $0x18] sm:$0xff]  ;;  %v551_v10 = vadd.f32 %v534_v3, %v474_v44  ;;  %v614_v11 = vadd.f32 %v606_v40, %v582_v59  ;;  %v583_v13 = vadd.f32 %v1010_v33, %v569_v6  ;;  %v567_v15 = vld [vmem:[#allocation2 + $0x8] sm:$0xff]  ;;  %468 = vst.msk [vmem:[#allocation2 + $0x38] sm:$0xff] %vm317_vm1, %v460_v0  ;;  %v609_v43 = vld [vmem:[%s1003_s10 + $0x50] sm:$0xff] }
  0xf4   : > { %v631_v12 = vadd.f32 %v796_v45, %v598_v60  ;;  %v599_v14 = vadd.f32 %v1010_v33, %v591_v7  ;;  %v589_v16 = vld [vmem:[#allocation3 + $0x8] sm:$0xff]  ;;  %561 = vst.msk [vmem:[#allocation3 + $0x38] sm:$0xff] %vm317_vm1, %v553_v1  ;;  %v612_v18 = vadd.f32 %v604_v46, %v580_v4  ;;  %v581_v20 = vadd.f32 %v1010_v33, %v567_v15  ;;  %v801_v38 = vld [vmem:[%s1003_s10 + $0x78] sm:$0xff] }
  0xf5   : > { %v629_v19 = vadd.f32 %v794_v47, %v596_v5  ;;  %v597_v21 = vadd.f32 %v1010_v33, %v589_v16  ;;  %466 = vst.msk [vmem:[#allocation2 + $0x28] sm:$0xff] %vm317_vm1, %v458_v9  ;;  %559 = vst.msk [vmem:[#allocation3 + $0x28] sm:$0xff] %vm317_vm1, %v551_v10  ;;  %v615_v22 = vadd.f32 %v607_v54, %v583_v13 }
  0xf6   : > { %639 = vst.msk [vmem:[%s1029_s15 + $0x20] sm:$0xff] %vm317_vm1, %v614_v11  ;;  %804 = vst.msk [vmem:[%s1029_s15 + $0x28] sm:$0xff] %vm317_vm1, %v631_v12  ;;  %v632_v23 = vadd.f32 %v797_v63, %v599_v14  ;;  %v613_v24 = vadd.f32 %v605_v8, %v581_v20 }
  0xf7   : > { %637 = vst.msk [vmem:[%s1029_s15] sm:$0xff] %vm317_vm1, %v612_v18  ;;  %802 = vst.msk [vmem:[%s1029_s15 + $0x8] sm:$0xff] %vm317_vm1, %v629_v19  ;;  %v630_v25 = vadd.f32 %v795_v17, %v597_v21 }
  0xf8   : > { %640 = vst.msk [vmem:[%s1029_s15 + $0x30] sm:$0xff] %vm317_vm1, %v615_v22  ;;  %805 = vst.msk [vmem:[%s1029_s15 + $0x38] sm:$0xff] %vm317_vm1, %v632_v23  ;;  %v572_v30 = vld [vmem:[#allocation2 + $0x30] sm:$0xff] }
  0xf9   : > { %638 = vst.msk [vmem:[%s1029_s15 + $0x10] sm:$0xff] %vm317_vm1, %v613_v24  ;;  %803 = vst.msk [vmem:[%s1029_s15 + $0x18] sm:$0xff] %vm317_vm1, %v630_v25  ;;  %v594_v31 = vld [vmem:[#allocation3 + $0x30] sm:$0xff]  ;;  %v586_v34 = vadd.f32 %v1010_v33, %v572_v30  ;;  %v570_v36 = vld [vmem:[#allocation2 + $0x20] sm:$0xff] }
  0xfa   : > { %v602_v35 = vadd.f32 %v1010_v33, %v594_v31  ;;  %v592_v37 = vld [vmem:[#allocation3 + $0x20] sm:$0xff]  ;;  %v584_v39 = vadd.f32 %v1010_v33, %v570_v36  ;;  %v573_v41 = vld [vmem:[#allocation2 + $0x38] sm:$0xff] }
  0xfb   : > { %v600_v40 = vadd.f32 %v1010_v33, %v592_v37  ;;  %v595_v42 = vld [vmem:[#allocation3 + $0x38] sm:$0xff]  ;;  %v618_v44 = vadd.f32 %v610_v26, %v586_v34  ;;  %v587_v46 = vadd.f32 %v1010_v33, %v573_v41 }
  0xfc   : > { %v635_v45 = vadd.f32 %v800_v27, %v602_v35  ;;  %v603_v47 = vadd.f32 %v1010_v33, %v595_v42  ;;  %v571_v48 = vld [vmem:[#allocation2 + $0x28] sm:$0xff]  ;;  %v616_v51 = vadd.f32 %v608_v28, %v584_v39 }
  0xfd   : > { %v593_v49 = vld [vmem:[#allocation3 + $0x28] sm:$0xff]  ;;  %v633_v52 = vadd.f32 %v798_v29, %v600_v40  ;;  %v585_v53 = vadd.f32 %v1010_v33, %v571_v48  ;;  %643 = vst.msk [vmem:[%s1029_s15 + $0x60] sm:$0xff] %vm317_vm1, %v618_v44  ;;  %v619_v55 = vadd.f32 %v611_v32, %v587_v46 }
  0xfe   : > { %v601_v54 = vadd.f32 %v1010_v33, %v593_v49  ;;  %808 = vst.msk [vmem:[%s1029_s15 + $0x68] sm:$0xff] %vm317_vm1, %v635_v45  ;;  %v636_v56 = vadd.f32 %v801_v38, %v603_v47  ;;  %641 = vst.msk [vmem:[%s1029_s15 + $0x40] sm:$0xff] %vm317_vm1, %v616_v51 }
  0xff   : > { %806 = vst.msk [vmem:[%s1029_s15 + $0x48] sm:$0xff] %vm317_vm1, %v633_v52  ;;  %v617_v57 = vadd.f32 %v609_v43, %v585_v53  ;;  %644 = vst.msk [vmem:[%s1029_s15 + $0x70] sm:$0xff] %vm317_vm1, %v619_v55 }
 0x100   : > { %v634_v58 = vadd.f32 %v799_v50, %v601_v54  ;;  %809 = vst.msk [vmem:[%s1029_s15 + $0x78] sm:$0xff] %vm317_vm1, %v636_v56 }
 0x101   : > { %642 = vst.msk [vmem:[%s1029_s15 + $0x50] sm:$0xff] %vm317_vm1, %v617_v57 }
 0x102   : > { %807 = vst.msk [vmem:[%s1029_s15 + $0x58] sm:$0xff] %vm317_vm1, %v634_v58 }
 0x103 PF: > { %s15_s20 = sadd.s32 1, %s897_s20   ;;  %s1109_s18 = smov %s893_s19 }
 0x104   : > { %p12_p5 = scmp.ge.s32.totalorder %s15_s20, 4   ;;  %s1110_s19 = smov %s1112_s21 }
 0x106   :  { %14 = sbr.rel (!%p12_p5) target bundleno = 2 (0x2), region = 89 }

</bundles_post_ra>
